<compile_context>
chip_gen: v7x
topology: tpu7x:2x2x1
jax: 0.10.0
libtpu: 0.0.40
codegen_flags: <defaults>
</compile_context>

<pallas_src>
import functools

import jax
import jax.numpy as jnp
from jax.experimental import pallas as pl
from jax.experimental.pallas import tpu as pltpu


def _round_up(v, m):
    return (v + m - 1) // m * m


def _pick_batch_block(n, cap, min_steps=4):
    """Largest divisor of n that is <= cap, preferring >= min_steps grid steps."""
    cap = max(1, min(cap, n))
    divisors = [d for d in range(1, n + 1) if n % d == 0 and d <= cap]
    for required in (min_steps, 2, 1):
        good = [d for d in divisors if n // d >= required]
        if good:
            return max(good)
    return 1


def _vmem_capacity_bytes():
    try:
        return int(pltpu.get_tpu_info().vmem_capacity_bytes)
    except Exception:
        return 64 << 20  # conservative (v7x-sized) fallback


def _excite(s, w1t_ref, b1_ref, w2t_ref, b2_ref):
    """Excitation MLP on pooled features. s: (nb, C) f32 -> (nb, C) f32."""
    w1 = w1t_ref[...]
    h = jnp.dot(s.astype(w1.dtype), w1,
                preferred_element_type=jnp.float32) + b1_ref[...]
    h = h + jax.nn.sigmoid(h)                       # module's Swish: x + sigmoid(x)
    w2 = w2t_ref[...]
    z = jnp.dot(h.astype(w2.dtype), w2,
                preferred_element_type=jnp.float32) + b2_ref[...]
    return jax.nn.sigmoid(z)


def _se_fused_kernel(x_ref, w1t_ref, b1_ref, w2t_ref, b2_ref, o_ref, *, inv_hw):
    # One-pass kernel: x_ref is a (nb, C, HW) block in the input dtype.
    x = x_ref[...]
    # Squeeze: f32 accumulation only (divide by the true HW).
    s = jnp.sum(x, axis=-1, dtype=jnp.float32) * inv_hw         # (nb, C)
    z = _excite(s, w1t_ref, b1_ref, w2t_ref, b2_ref)            # (nb, C) f32
    # Scale: keep the large elementwise multiply in x's dtype (v5e: 1 vst slot).
    o_ref[...] = (x * z.astype(x.dtype)[:, :, None]).astype(o_ref.dtype)


def _se_pool_excite_kernel(x_ref, w1t_ref, b1_ref, w2t_ref, b2_ref, z_ref,
                           acc_ref, *, inv_hw, hw, t_hw, needs_mask):
    # Two-pass / pass A: x_ref is (nb, C, t_hw); accumulate per-channel sums,
    # run the excitation on the last HW tile, emit z as (nb, C, 1) f32.
    h_idx = pl.program_id(1)

    @pl.when(h_idx == 0)
    def _():
        acc_ref[...] = jnp.zeros_like(acc_ref)

    x = x_ref[...]
    if needs_mask:
        lane = jax.lax.broadcasted_iota(jnp.int32, x.shape, 2)
        x = jnp.where(h_idx * t_hw + lane < hw, x, jnp.zeros_like(x))
    acc_ref[...] += jnp.sum(x, axis=-1, dtype=jnp.float32)

    @pl.when(h_idx == pl.num_programs(1) - 1)
    def _():
        s = acc_ref[...] * inv_hw
        z = _excite(s, w1t_ref, b1_ref, w2t_ref, b2_ref)         # (nb, C)
        z_ref[...] = z[:, :, None].astype(z_ref.dtype)           # (nb, C, 1)


def _se_scale_kernel(x_ref, z_ref, o_ref):
    # Two-pass / pass B: lane-tiled elementwise scale, stays in x's dtype.
    x = x_ref[...]
    o_ref[...] = (x * z_ref[...].astype(x.dtype)).astype(o_ref.dtype)


def se_block(x_nchw, w1, b1, w2, b2, *, force_two_pass=False, max_tile_hw=None):
    """x_nchw: (N, C, H, W); w1: (4C, C); b1: (4C,); w2: (C, 4C); b2: (C,)."""
    N, C, H, W = x_nchw.shape
    HW = H * W
    C4 = w1.shape[0]
    dtype = x_nchw.dtype
    itemsize = jnp.dtype(dtype).itemsize
    inv_hw = 1.0 / HW

    x = x_nchw.reshape(N, C, HW)     # contiguous reshape, no extra HBM pass

    vmem_cap = _vmem_capacity_bytes()
    vmem_soft = int(vmem_cap * 0.45)           # working-set budget w/ headroom
    vmem_hard = int(vmem_cap * 0.85)           # never request > physical VMEM

    # --- weights (transposed once; constant index_map in the kernels) ---
    w_f32_bytes = 2 * C * C4 * 4
    big_weights = w_f32_bytes > (2 << 20)
    wdtype = jnp.bfloat16 if big_weights else jnp.float32
    w1t = jnp.asarray(w1, jnp.float32).T.astype(wdtype)          # (C, 4C)
    w2t = jnp.asarray(w2, jnp.float32).T.astype(wdtype)          # (4C, C)
    b1r = jnp.asarray(b1, jnp.float32).reshape(1, C4)
    b2r = jnp.asarray(b2, jnp.float32).reshape(1, C)
    wbytes = (w1t.size + w2t.size) * jnp.dtype(wdtype).itemsize + (C4 + C) * 4
    # Large weights: single VMEM copy (index_map is constant => no refetch).
    weight_mode = pl.Buffered(1) if big_weights else None
    weight_vmem = wbytes * (1 if big_weights else 2)

    def weight_specs(index_map):
        shapes = [(C, C4), (1, C4), (C4, C), (1, C)]
        if weight_mode is not None:
            return [pl.BlockSpec(s, index_map, pipeline_mode=weight_mode)
                    for s in shapes]
        return [pl.BlockSpec(s, index_map) for s in shapes]

    # --- one-pass feasibility: in+out double-buffered + room for an f32 temp ---
    slab = C * HW * itemsize                       # one batch element of x
    per_nb = 4 * slab + C * HW * 4
    usable = vmem_soft - weight_vmem - (1 << 20)
    one_pass = ((not force_two_pass) and per_nb <= usable
                and not (N == 1 and slab > (8 << 20)))

    if one_pass:
        nb_cap = min(max(1, usable // per_nb),
                     max(1, (8 << 20) // max(slab, 1)),   # ~8 MiB x-blocks
                     32)
        nb = _pick_batch_block(N, nb_cap)
        grid = (N // nb,)

        vmem_needed = nb * per_nb + weight_vmem + (2 << 20)
        vmem_limit = int(min(max(vmem_needed, 16 << 20), vmem_hard))

        cost = pl.CostEstimate(
            flops=int(N * (3 * C * HW + 4 * C * C4 + 2 * (C4 + C))),
            transcendentals=int(N * (C4 + C)),
            bytes_accessed=int(2 * N * C * HW * itemsize + wbytes),
        )

        kernel = functools.partial(_se_fused_kernel, inv_hw=inv_hw)
        out = pl.pallas_call(
            kernel,
            out_shape=jax.ShapeDtypeStruct((N, C, HW), dtype),
            grid_spec=pltpu.PrefetchScalarGridSpec(
                num_scalar_prefetch=0,
                grid=grid,
                in_specs=[pl.BlockSpec((nb, C, HW), lambda n: (n, 0, 0))]
                         + weight_specs(lambda n: (0, 0)),
                out_specs=pl.BlockSpec((nb, C, HW), lambda n: (n, 0, 0)),
            ),
            compiler_params=pltpu.CompilerParams(
                dimension_semantics=("parallel",),
                vmem_limit_bytes=vmem_limit,
            ),
            cost_estimate=cost,
        )(x, w1t, b1r, w2t, b2r)
        return out.reshape(N, C, H, W)

    # --- two-pass fallback (big slabs / N == 1): tile the spatial axis ---
    lane_bytes = C * max(2 * itemsize + 4, 4 * itemsize)    # per-HW-lane VMEM cost
    t_hw = max(1, (vmem_soft - weight_vmem - (1 << 20)) // max(lane_bytes, 1))
    t_hw = min(t_hw, max(1, (4 << 20) // max(C * itemsize, 1)))   # ~4 MiB tiles
    if max_tile_hw is not None:
        t_hw = min(t_hw, max_tile_hw)
    t_hw = max(128, (t_hw // 128) * 128)
    t_hw = min(t_hw, _round_up(HW, 128))
    hsteps = pl.cdiv(HW, t_hw)
    needs_mask = (HW % t_hw) != 0

    vmem_needed = (6 * C * t_hw * itemsize + C * t_hw * 4
                   + weight_vmem + (2 << 20))
    vmem_limit = int(min(max(vmem_needed, 16 << 20), vmem_hard))

    cost_a = pl.CostEstimate(
        flops=int(N * (2 * C * HW + 4 * C * C4 + 2 * (C4 + C))),
        transcendentals=int(N * (C4 + C)),
        bytes_accessed=int(N * C * HW * itemsize + wbytes + N * C * 4),
    )
    kernel_a = functools.partial(_se_pool_excite_kernel, inv_hw=inv_hw,
                                 hw=HW, t_hw=t_hw, needs_mask=needs_mask)
    z = pl.pallas_call(
        kernel_a,
        out_shape=jax.ShapeDtypeStruct((N, C, 1), jnp.float32),
        grid_spec=pltpu.PrefetchScalarGridSpec(
            num_scalar_prefetch=0,
            grid=(N, hsteps),
            in_specs=[pl.BlockSpec((1, C, t_hw), lambda n, h: (n, 0, h))]
                     + weight_specs(lambda n, h: (0, 0)),
            out_specs=pl.BlockSpec((1, C, 1), lambda n, h: (n, 0, 0)),
            scratch_shapes=[pltpu.VMEM((1, C), jnp.float32)],
        ),
        compiler_params=pltpu.CompilerParams(
            dimension_semantics=("parallel", "arbitrary"),
            vmem_limit_bytes=vmem_limit,
        ),
        cost_estimate=cost_a,
    )(x, w1t, b1r, w2t, b2r)

    cost_b = pl.CostEstimate(
        flops=int(N * C * HW),
        transcendentals=0,
        bytes_accessed=int(2 * N * C * HW * itemsize + N * C * 4),
    )
    out = pl.pallas_call(
        _se_scale_kernel,
        out_shape=jax.ShapeDtypeStruct((N, C, HW), dtype),
        grid_spec=pltpu.PrefetchScalarGridSpec(
            num_scalar_prefetch=0,
            grid=(N, hsteps),
            in_specs=[
                pl.BlockSpec((1, C, t_hw), lambda n, h: (n, 0, h)),
                pl.BlockSpec((1, C, 1), lambda n, h: (n, 0, 0)),
            ],
            out_specs=pl.BlockSpec((1, C, t_hw), lambda n, h: (n, 0, h)),
        ),
        compiler_params=pltpu.CompilerParams(
            dimension_semantics=("parallel", "parallel"),
            vmem_limit_bytes=vmem_limit,
        ),
        cost_estimate=cost_b,
    )(x, z)
    return out.reshape(N, C, H, W)


def se_block_ref(x, w1, b1, w2, b2):
    s = x.mean(axis=(2, 3))                    # (N, C)
    h = s @ w1.T + b1
    h = h + jax.nn.sigmoid(h)
    z = h @ w2.T + b2
    z = jax.nn.sigmoid(z)
    return x * z[:, :, None, None]


if __name__ == "__main__":
    key = jax.random.PRNGKey(0)

    # --- main test: fused one-pass path ---
    N, C, H, W = 2, 4, 16, 16
    C4 = C * 4                                 # excitation hidden = in_channels * 4
    kx, k1, kb1, k2, kb2 = jax.random.split(key, 5)
    x = jax.random.normal(kx, (N, C, H, W), dtype=jnp.float32)
    w1 = jax.random.normal(k1, (C4, C), dtype=jnp.float32) * 0.2
    b1 = jax.random.normal(kb1, (C4,), dtype=jnp.float32) * 0.1
    w2 = jax.random.normal(k2, (C, C4), dtype=jnp.float32) * 0.2
    b2 = jax.random.normal(kb2, (C,), dtype=jnp.float32) * 0.1

    out = jax.block_until_ready(se_block(x, w1, b1, w2, b2))
    ref = se_block_ref(x, w1, b1, w2, b2)
    assert out.shape == (N, C, H, W)
    assert jnp.allclose(out, ref, atol=1e-5, rtol=1e-5), "one-pass mismatch"

    # --- second test: exercise the two-pass (HW-tiled) fallback, including a
    #     non-multiple-of-128 spatial size (edge-tile masking) ---
    N2, C2, H2, W2 = 2, 8, 20, 20
    C8 = C2 * 4
    kx2, k12, kb12, k22, kb22 = jax.random.split(jax.random.PRNGKey(0), 5)
    x2 = jax.random.normal(kx2, (N2, C2, H2, W2), dtype=jnp.float32)
    w12 = jax.random.normal(k12, (C8, C2), dtype=jnp.float32) * 0.2
    b12 = jax.random.normal(kb12, (C8,), dtype=jnp.float32) * 0.1
    w22 = jax.random.normal(k22, (C2, C8), dtype=jnp.float32) * 0.2
    b22 = jax.random.normal(kb22, (C2,), dtype=jnp.float32) * 0.1

    out2 = jax.block_until_ready(
        se_block(x2, w12, b12, w22, b22, force_two_pass=True, max_tile_hw=128))
    ref2 = se_block_ref(x2, w12, b12, w22, b22)
    assert out2.shape == (N2, C2, H2, W2)
    assert jnp.allclose(out2, ref2, atol=1e-5, rtol=1e-5), "two-pass mismatch"

    print("KERNEL_OK")
</pallas_src>

<mosaic_0001>
module attributes {stable_mosaic.version = 11 : i64} {
  func.func @_se_fused_kernel(%arg0: i32, %arg1: memref<1x4x256xf32, #tpu.memory_space<vmem>>, %arg2: memref<4x16xf32, #tpu.memory_space<vmem>>, %arg3: memref<1x16xf32, #tpu.memory_space<vmem>>, %arg4: memref<16x4xf32, #tpu.memory_space<vmem>>, %arg5: memref<1x4xf32, #tpu.memory_space<vmem>>, %arg6: memref<1x4x256xf32, #tpu.memory_space<vmem>>) attributes {dimension_semantics = [#tpu.dimension_semantics<parallel>], iteration_bounds = array<i64: 2>, scalar_prefetch = 0 : i64, scratch_operands = 0 : i64, tpu.core_type = #tpu.core_type<tc>, window_params = [{transform_indices = @transform_0, window_bounds = array<i64: 1, 4, 256>}, {pipeline_mode = #tpu.pipeline_mode<synchronous>, transform_indices = @transform_1, window_bounds = array<i64: 4, 16>}, {pipeline_mode = #tpu.pipeline_mode<synchronous>, transform_indices = @transform_2, window_bounds = array<i64: 1, 16>}, {pipeline_mode = #tpu.pipeline_mode<synchronous>, transform_indices = @transform_3, window_bounds = array<i64: 16, 4>}, {pipeline_mode = #tpu.pipeline_mode<synchronous>, transform_indices = @transform_4, window_bounds = array<i64: 1, 4>}, {transform_indices = @transform_5, window_bounds = array<i64: 1, 4, 256>}]} {
    %c0 = arith.constant 0 : index
    %c0_0 = arith.constant 0 : index
    %c0_1 = arith.constant 0 : index
    %0 = vector.load %arg1[%c0, %c0_0, %c0_1] : memref<1x4x256xf32, #tpu.memory_space<vmem>>, vector<1x4x256xf32>
    %cst = arith.constant dense<0.000000e+00> : vector<1x4xf32>
    %1 = vector.multi_reduction <add>, %0, %cst [2] : vector<1x4x256xf32> to vector<1x4xf32>
    %cst_2 = arith.constant 3.906250e-03 : f32
    %2 = vector.broadcast %cst_2 : f32 to vector<1x4xf32>
    %3 = arith.mulf %1, %2 : vector<1x4xf32>
    %c0_3 = arith.constant 0 : index
    %c0_4 = arith.constant 0 : index
    %4 = vector.load %arg2[%c0_3, %c0_4] : memref<4x16xf32, #tpu.memory_space<vmem>>, vector<4x16xf32>
    %cst_5 = arith.constant dense<0.000000e+00> : vector<1x16xf32>
    %5 = tpu.matmul %3, %4, %cst_5 {dimension_numbers = #tpu.dot_dimension_numbers<[1], [0], [0], [1], [0, 0, 1, 1], [], []>} : vector<1x4xf32>, vector<4x16xf32>, vector<1x16xf32> -> vector<1x16xf32>
    %c0_6 = arith.constant 0 : index
    %c0_7 = arith.constant 0 : index
    %6 = vector.load %arg3[%c0_6, %c0_7] : memref<1x16xf32, #tpu.memory_space<vmem>>, vector<1x16xf32>
    %7 = arith.addf %5, %6 : vector<1x16xf32>
    %8 = arith.negf %7 : vector<1x16xf32>
    %9 = math.exp %8 : vector<1x16xf32>
    %cst_8 = arith.constant 1.000000e+00 : f32
    %10 = vector.broadcast %cst_8 : f32 to vector<1x16xf32>
    %11 = arith.addf %10, %9 : vector<1x16xf32>
    %12 = arith.divf %10, %11 : vector<1x16xf32>
    %13 = arith.addf %7, %12 : vector<1x16xf32>
    %c0_9 = arith.constant 0 : index
    %c0_10 = arith.constant 0 : index
    %14 = vector.load %arg4[%c0_9, %c0_10] : memref<16x4xf32, #tpu.memory_space<vmem>>, vector<16x4xf32>
    %cst_11 = arith.constant dense<0.000000e+00> : vector<1x4xf32>
    %15 = tpu.matmul %13, %14, %cst_11 {dimension_numbers = #tpu.dot_dimension_numbers<[1], [0], [0], [1], [0, 0, 1, 1], [], []>} : vector<1x16xf32>, vector<16x4xf32>, vector<1x4xf32> -> vector<1x4xf32>
    %c0_12 = arith.constant 0 : index
    %c0_13 = arith.constant 0 : index
    %16 = vector.load %arg5[%c0_12, %c0_13] : memref<1x4xf32, #tpu.memory_space<vmem>>, vector<1x4xf32>
    %17 = arith.addf %15, %16 : vector<1x4xf32>
    %18 = arith.negf %17 : vector<1x4xf32>
    %19 = math.exp %18 : vector<1x4xf32>
    %cst_14 = arith.constant 1.000000e+00 : f32
    %20 = vector.broadcast %cst_14 : f32 to vector<1x4xf32>
    %21 = arith.addf %20, %19 : vector<1x4xf32>
    %22 = arith.divf %20, %21 : vector<1x4xf32>
    %23 = vector.shape_cast %22 : vector<1x4xf32> to vector<1x4x1xf32>
    %24 = vector.broadcast %23 : vector<1x4x1xf32> to vector<1x4x256xf32>
    %25 = arith.mulf %0, %24 : vector<1x4x256xf32>
    %c0_15 = arith.constant 0 : index
    %c0_16 = arith.constant 0 : index
    %c0_17 = arith.constant 0 : index
    %26 = vector.load %arg6[%c0_15, %c0_16, %c0_17] : memref<1x4x256xf32, #tpu.memory_space<vmem>>, vector<1x4x256xf32>
    tpu.vector_store %arg6[%c0_15, %c0_16, %c0_17], %25 {strides = array<i32>} : memref<1x4x256xf32, #tpu.memory_space<vmem>>, vector<1x4x256xf32>,
    return
  }
  func.func @transform_0(%arg0: i32) -> (i32, i32, i32) {
    %c0_i32 = arith.constant 0 : i32
    %c0_i32_0 = arith.constant 0 : i32
    %c0_i32_1 = arith.constant 0 : i32
    return %arg0, %c0_i32, %c0_i32_0 : i32, i32, i32
  }
  func.func @transform_1(%arg0: i32) -> (i32, i32) {
    %c0_i32 = arith.constant 0 : i32
    %c0_i32_0 = arith.constant 0 : i32
    %c0_i32_1 = arith.constant 0 : i32
    return %c0_i32, %c0_i32_0 : i32, i32
  }
  func.func @transform_2(%arg0: i32) -> (i32, i32) {
    %c0_i32 = arith.constant 0 : i32
    %c0_i32_0 = arith.constant 0 : i32
    %c0_i32_1 = arith.constant 0 : i32
    return %c0_i32, %c0_i32_0 : i32, i32
  }
  func.func @transform_3(%arg0: i32) -> (i32, i32) {
    %c0_i32 = arith.constant 0 : i32
    %c0_i32_0 = arith.constant 0 : i32
    %c0_i32_1 = arith.constant 0 : i32
    return %c0_i32, %c0_i32_0 : i32, i32
  }
  func.func @transform_4(%arg0: i32) -> (i32, i32) {
    %c0_i32 = arith.constant 0 : i32
    %c0_i32_0 = arith.constant 0 : i32
    %c0_i32_1 = arith.constant 0 : i32
    return %c0_i32, %c0_i32_0 : i32, i32
  }
  func.func @transform_5(%arg0: i32) -> (i32, i32, i32) {
    %c0_i32 = arith.constant 0 : i32
    %c0_i32_0 = arith.constant 0 : i32
    %c0_i32_1 = arith.constant 0 : i32
    return %arg0, %c0_i32, %c0_i32_0 : i32, i32, i32
  }
}

</mosaic_0001>

<bundles_post_ra>
// kernel: tpu_custom_call.1
= control target key start
LH: loop header
LB: loop body
LE: loop exit
PB: predicated region body
PF: predicated region fallthrough
CT: control target
= control target key end

     0   :  { %10 = vsyncpa [#allocation3], 0  ;;  %s812_s0 = inlined_call_operand.vmem [shape: f32[2,4,256], index: 0, kind: input, shape index: {}]   ;;  %s813_s1 = inlined_call_operand.vmem [shape: f32[4,16], index: 1, kind: input, shape index: {}]   ;;  %s814_s2 = inlined_call_operand.vmem [shape: f32[1,16], index: 2, kind: input, shape index: {}]   ;;  %s815_s3 = inlined_call_operand.vmem [shape: f32[16,4], index: 3, kind: input, shape index: {}]   ;;  %s816_s4 = inlined_call_operand.vmem [shape: f32[1,4], index: 4, kind: input, shape index: {}]   ;;  %s817_s5 = inlined_call_operand.hbm [shape: f32[2,4,256], index: 5, kind: output, shape index: {}]  }
   0x1   :  { %12 = vsyncpa [#allocation3 + $0x1], 0  ;;  %s691_s18 = smov 0   ;;  %s693_s19 = smov 0  }
   0x2   :  { %s695_s20 = smov 0   ;;  %s697_s21 = smov 0  }
   0x3 LB: > { %s712_s22 = sadd.s32 4294967295, %s654_s21   ;;  %s501_s23 = sadd.s32 4294967294, %s654_s21   ;;  %s654_s21 = sphi %s697_s21, %s823_s21   ;;  %s650_s20 = sphi %s695_s20, %s822_s20   ;;  %s646_s19 = sphi %s693_s19, %s821_s19   ;;  %s642_s18 = sphi %s691_s18, %s820_s18  }
   0x4   : > { %s716_s24 = sadd.s32 1, %s654_s21   ;;  %s135_s25 = sadd.s32 1, %s650_s20 }
   0x5   : > { %s132_s26 = ssub.s32 %s654_s21, %s716_s24  ;;  %p145_p0 = scmp.ne.s32.totalorder %s650_s20, %s646_s19 }
   0x6   : > { %p133_p1 = scmp.eq.s32.totalorder %s132_s26, 0  ;;  %p146_p2 = scmp.eq.s32.totalorder %s712_s22, 1 }
   0x7   : > { %p151_p3 = scmp.ne.s32.totalorder %s646_s19, %s642_s18  ;;  %p152_p4 = scmp.eq.s32.totalorder %s501_s23, 1 }
   0x8   : > { %s727_s27 = scalar_select %p133_p1, %s650_s20, %s135_s25  }
   0x9   : > { %p729_p5 = por %p146_p2, %p145_p0  ;;  %p733_p6 = por %p152_p4, %p151_p3 }
   0xa   : > { %p504_p7 = scmp.ge.s32.totalorder %s654_s21, 1  ;;  %p190_p8 = scmp.lt.s32.totalorder %s654_s21, 3 }
   0xc   : > { %p191_p9 = pnand %p504_p7, %p190_p8 }
   0xd   : > { %p218_p10 = scmp.lt.s32.totalorder (!%p191_p9), %s712_s22, 1  ;;  %vm227_vm0 = vcmask (!%p191_p9), 1043456   ;;  %v656_v5 = vmov (!%p191_p9), 0.0   ;;  %v234_v6 = vld [vmem:[%s813_s1] sm:$0xf] (!%p191_p9)  ;;  %vm657_vm1 = vmmov (!%p191_p9), 0   ;;  %v237_v7 = vlaneseq (!%p191_p9) }
   0xe   : > { %194 = sbr.rel (%p191_p9) target bundleno = 794 (0x31a), region = 40  ;;  %525 = vmatprep.subr.mxu0 (!%p191_p9), %v656_v5  ;;  %527 = vmatprep.mubr.msk.f32.mxu0 (!%p191_p9), %vm657_vm1, %v656_v5  ;;  %vm243_vm2 = vcmask (!%p191_p9), 31744   ;;  %v326_v14 = vld [vmem:[%s815_s3] sm:$0xff] (!%p191_p9)  ;;  %v327_v15 = vld [vmem:[%s815_s3 + $0x8] sm:$0xff] (!%p191_p9)  ;;  %v658_v17 = vmov (!%p191_p9), 0.0|0.0   ;;  %vm329_vm3 = vcmask (!%p191_p9), 130048  }
   0xf   : > { %526 = vmatpush3.msk.msra.mxu0 (!%p191_p9), %vm227_vm0, %v234_v6  ;;  %534 = vmatprep.mubr.msk.f32.mxu1 (!%p191_p9), %vm657_vm1, %v656_v5  ;;  %v238_v8 = vand.u32 (!%p191_p9), 127, %v237_v7  ;;  %v240_v9 = vshrl.u32 (!%p191_p9), %v237_v7, 7  ;;  %v538_v16 = vpack.c.bf16 (!%p191_p9), %v327_v15, %v326_v14  ;;  %v235_v18 = vld [vmem:[%s814_s2] sm:$0x1] (!%p191_p9)  ;;  %v659_v37 = vmov (!%p191_p9), 839922192  }
  0x10   : > { %537 = vmatprep.subr.bf16.mxu1 (!%p191_p9), %v658_v17  ;;  %v328_v27 = vld [vmem:[%s816_s4] sm:$0x1] (!%p191_p9)  ;;  %v418_v38 = vunpack.c.l.s4 (!%p191_p9), %v659_v37  ;;  %s215_s26 = sand.u32 (!%p191_p9), 1, %s646_s19  }
  0x11   : > { %v241_v10 = vsub.s32 (!%p191_p9), %v238_v8, %v240_v9  ;;  %539 = vmatpush3.bf16.msra.mxu1 (!%p191_p9), %v538_v16  ;;  %v411_v34 = vsub.s32 (!%p191_p9), 0, %v240_v9  ;;  %s428_s12 = scalar_lea.sflag (!%p191_p9), [#allocation3], %s215_s26 }
  0x12   : > { %v419_v39 = vunpack.c.0.s8 (!%p191_p9), %v418_v38 }
  0x14   : > { %v422_v40 = vsub.s32 (!%p191_p9), %v419_v39, %v240_v9 }
  0x15   : > { %s219_s30 = scalar_select %p218_p10, %s712_s22, 1 }
  0x17   : > { %s518_s6 = sshll.u32 %s219_s30, 3  ;;  %s505_s30 = sshll.u32 %s215_s26, 3 }
  0x18   : > { %s222_s9 = scalar_lea.vmem %s812_s0, %s518_s6  ;;  %s519_s6 = sshll.u32 %s712_s22, 7 }
  0x19   : > { %v744_v0 = vld [vmem:[%s222_s9] sm:$0xff]  ;;  %s217_s7 = scalar_lea.vmem [#allocation2], %s505_s30  ;;  %s770_s11 = scalar_lea.hbm %s817_s5, %s519_s6 }
  0x1a   : > { %v225_v1 = vcombine.high %v744_v0, %v744_v0  ;;  %v228_v2 = vsel %vm227_vm0, %v744_v0, 0.0  ;;  %s442_s8 = sshll.u32 %s217_s7, 4  ;;  %s660_s22 = smov [#allocation2]   ;;  %s772_s8 = int_to_ptr.vmem [resolvable:$true] %s442_s8 }
  0x1b   : > { %s592_s13 = scalar_lea.vmem %s772_s8, 128  ;;  %s596_s14 = sshll.u32 %s660_s22, 4  ;;  %s597_s14 = int_to_ptr.vmem [resolvable:$false] %s596_s14 }
  0x1c   : > { %v229_v3 = vsel %vm227_vm0, %v225_v1, 0.0  ;;  %p593_p11 = scmp.ne.s32.totalorder %s772_s8, %s592_s13  ;;  %s598_s15 = scalar_lea.vmem %s597_s14, 256 }
  0x1d   : > { %v230_v4 = vadd.f32 %v229_v3, %v228_v2  ;;  %p599_p0 = scmp.lt.s32.totalorder %s772_s8, %s597_s14  ;;  %p600_p1 = scmp.lt.s32.totalorder %s598_s15, %s592_s13 }
  0x1e   : > { %p594_p12 = pnand %p593_p11, %p729_p5 }
  0x1f   : > { %231 = vadd.xlane.f32.xlu0 %v230_v4  ;;  %p601_p2 = por %p600_p1, %p599_p0 }
  0x20   : > { %p595_p13 = pneg %p594_p12 }
  0x22   : > { %p602_p3 = pnand %p601_p2, %p595_p13 }
  0xac   : > { %v232_v11 = vpop.xlane.xlu0 %231 }
  0xad   : > { %v233_v12 = vmul.f32 0.00390625, %v232_v11 }
  0xaf   : > { %v242_v13 = vrot.slane %v233_v12, %v241_v10 }
  0xb1   : > { %528 = vmatmul.mubr.msk.f32.vlgmr.msra.gmra.mrb[0].mxu0 %vm243_vm2, %v242_v13 }
 0x184   : > { %v315_v19 = vpop.f32.mrb[0].mxu0 }
 0x185   : > { %v316_v20 = vadd.f32 %v315_v19, %v235_v18  ;;  %v529_v21 = vpop.f32.mrb[1].mxu0 }
 0x187   : > { %v510_v22 = vmul.f32 -1.442695, %v316_v20 }
 0x189   : > { %584 = vpow2.f32 %v510_v22 }
 0x193   : > { %v585_v23 = vpop.eup %584 }
 0x194   : > { %v322_v24 = vadd.f32 1.0, %v585_v23 }
 0x196   : > { %586 = vrcp.f32 %v322_v24 }
 0x1a0   : > { %v587_v25 = vpop.eup %586 }
 0x1a1   : > { %v325_v26 = vadd.f32 %v587_v25, %v316_v20 }
 0x1a3   : > { %535 = vmatmul.mubr.msk.f32.vlgmr.msra.gmra.mrb[0].mxu1 %vm329_vm3, %v325_v26 }
 0x276   : > { %v399_v28 = vpop.f32.mrb[0].mxu1 }
 0x277   : > { %v400_v29 = vadd.f32 %v399_v28, %v328_v27  ;;  %v536_v30 = vpop.f32.mrb[1].mxu1 }
 0x279   : > { %v512_v31 = vmul.f32 -1.442695, %v400_v29 }
 0x27b   : > { %588 = vpow2.f32 %v512_v31 }
 0x285   : > { %v589_v32 = vpop.eup %588 }
 0x286   : > { %v406_v33 = vadd.f32 1.0, %v589_v32 }
 0x288   : > { %590 = vrcp.f32 %v406_v33 }
 0x292   : > { %v591_v35 = vpop.eup %590 }
 0x293   : > { %v412_v36 = vrot.slane %v591_v35, %v411_v34 }
 0x295   : > { %414 = vbcast.lane.b32.xlu0 %v412_v36, 256 }
 0x307   : > { %v415_v41 = vpop.permute.xlu0 %414 }
 0x308   : > { %v423_v42 = vrot.slane %v415_v41, %v422_v40 }
 0x30a   : > { %v425_v43 = vmul.f32 %v423_v42, %v744_v0 }
 0x30c   : > { %426 = vst [vmem:[%s217_s7] sm:$0xff] %v425_v43 }
 0x30d   : > { %605 = shalt.err (!%p602_p3)
}
 0x30e   : > { %s606_s16 = scalar_lea.hbm %s770_s11, 128  ;;  %s610_s25 = scalar_lea.hbm %s817_s5, 256 }
 0x30f   : > { %p607_p4 = scmp.ne.s32.totalorder %s770_s11, %s606_s16  ;;  %p611_p9 = scmp.lt.u32.totalorder %s770_s11, %s817_s5 }
 0x310   : > { %p612_p10 = scmp.lt.u32.totalorder %s610_s25, %s606_s16  ;;  %p614_p12 = scmp.lt.u32.totalorder %s606_s16, %s770_s11 }
 0x311   : > { %p608_p7 = pnand %p607_p4, %p729_p5 }
 0x312   : > { %p613_p11 = por %p612_p10, %p611_p9 }
 0x313   : > { %p609_p8 = pneg %p608_p7 }
 0x314   : > { %p615_p13 = por %p614_p12, %p613_p11 }
 0x316   : > { %p616_p0 = pnand %p615_p13, %p609_p8 }
 0x318   : > { %619 = shalt.err (!%p616_p0)
}
 0x319   : > { %540 = dma.vmem_to_hbm [thread:$0]  (%p729_p5), %s772_s8, 128, %s770_s11, %s428_s12  }
 0x31a PF: > { %p546_p1 = scmp.ge.s32.totalorder %s654_s21, 2  ;;  %s454_s6 = sand.u32 1, %s642_s18  }
 0x31b   : > { %s455_s7 = scalar_lea.sflag [#allocation3], %s454_s6 }
 0x31c   : > { %p543_p2 = pnand %p546_p1, %p733_p6 }
 0x31e   : > { %637 = dma.done.wait (!%p543_p2), %s455_s7, 128  }
 0x31f   : > { %639 = vsyncadd (!%p543_p2), %s455_s7, 4294967168  ;;  %p15_p3 = scmp.ge.s32.totalorder %s716_s24, 4   ;;  %s820_s18 = smov %s646_s19 }
 0x320   : > { %s821_s19 = smov %s650_s20  ;;  %s822_s20 = smov %s727_s27 }
 0x321   : > { %s823_s21 = smov %s716_s24  ;;  %17 = sbr.rel (!%p15_p3) target bundleno = 3 (0x3), region = 75 }
 0x328   :  { %460 = vsyncpa [#allocation3], 1 }
 0x329   :  { %462 = vsyncpa [#allocation3 + $0x1], 1 }

</bundles_post_ra>
